<compile_context>
chip_gen: v7x
topology: tpu7x:2x2x1
jax: 0.10.0
libtpu: 0.0.40
codegen_flags: <defaults>
</compile_context>

<pallas_src>
import functools
import math

import jax
import jax.numpy as jnp
from jax.experimental import pallas as pl
from jax.experimental.pallas import tpu as pltpu


def _mha_kernel(k_ref, v_ref, q_ref, mask_ref, w_ref, b_ref, o_ref,
                *, batch, heads, head_size, s_q, s_k):
    # Stacked weights / biases: w_ref [4, E, E], b_ref [4, E]
    wk = w_ref[0]
    wv = w_ref[1]
    wq = w_ref[2]           # 1/sqrt(D) scale already folded in (wrapper)
    wo = w_ref[3]
    bk = b_ref[0:1, :]      # keep 2-D [1, E] for clean lane broadcast
    bv = b_ref[1:2, :]
    bq = b_ref[2:3, :]
    bo = b_ref[3:4, :]

    # Projections over the whole [B*S, E] slab (lane-dense, batch folded into
    # sublanes -> more MXU rows per matmul).
    K = jnp.dot(k_ref[...], wk, preferred_element_type=jnp.float32) + bk   # [B*S_k, E]
    V = jnp.dot(v_ref[...], wv, preferred_element_type=jnp.float32) + bv   # [B*S_k, E]
    Q = jnp.dot(q_ref[...], wq, preferred_element_type=jnp.float32) + bq   # [B*S_q, E]

    # Additive mask bias: 0 where key visible, -1e30 where masked.
    neg_bias = (1.0 - mask_ref[...].astype(jnp.float32)) * (-1e30)         # [B, S_k]

    ctx_rows = []
    for b in range(batch):                      # static / fully unrolled
        Kb = K[b * s_k:(b + 1) * s_k, :]        # [S_k, E]
        Vb = V[b * s_k:(b + 1) * s_k, :]
        Qb = Q[b * s_q:(b + 1) * s_q, :]        # [S_q, E]
        bias_b = neg_bias[b:b + 1, :]           # [1, S_k]

        head_outs = []
        for h in range(heads):                  # static / fully unrolled
            lo = h * head_size
            hi = lo + head_size
            Qh = Qb[:, lo:hi]                   # [S_q, D]  (lane slice, no transpose)
            Kh = Kb[:, lo:hi]                   # [S_k, D]
            Vh = Vb[:, lo:hi]                   # [S_k, D]

            # scores = Qh @ Kh.T, expressed via dot_general (contract last dims)
            s = jax.lax.dot_general(Qh, Kh, (((1,), (1,)), ((), ())),
                                    preferred_element_type=jnp.float32)    # [S_q, S_k]
            s = s + bias_b

            # Numerically-stable softmax; reciprocal goes to the EUP slot.
            m = jnp.max(s, axis=-1, keepdims=True)
            e = jnp.exp(s - m)
            denom = jnp.sum(e, axis=-1, keepdims=True)
            attn = e * pl.reciprocal(denom, approx=True)

            head_outs.append(
                jnp.dot(attn, Vh, preferred_element_type=jnp.float32))     # [S_q, D]

        ctx_rows.append(jnp.concatenate(head_outs, axis=-1))               # [S_q, E]

    ctx = jnp.concatenate(ctx_rows, axis=0)                                # [B*S_q, E]

    out = jnp.dot(ctx, wo, preferred_element_type=jnp.float32) + bo
    o_ref[...] = out.astype(o_ref.dtype)


def self_attention(k, v, q, mask, params, *, heads):
    """k, v: [B, S_k, E]; q: [B, S_q, E]; mask: [B, 1, S_k] (1 = attend)."""
    B, S_k, E = k.shape
    S_q = q.shape[1]
    D = E // heads
    scale = 1.0 / math.sqrt(D)

    # Fold the 1/sqrt(D) query scaling into the Q projection (host-side, once),
    # and stack weights/biases to cut operand count.
    w_all = jnp.stack([params['wk'], params['wv'],
                       params['wq'] * scale, params['wo']])      # [4, E, E]
    b_all = jnp.stack([params['bk'], params['bv'],
                       params['bq'] * scale, params['bo']])      # [4, E]

    # Lane-dense 2-D slabs (free reshapes: contiguous collapse of leading dims).
    k2 = k.reshape(B * S_k, E)
    v2 = v.reshape(B * S_k, E)
    q2 = q.reshape(B * S_q, E)
    m2 = mask.reshape(B, S_k).astype(jnp.int32)

    kernel = functools.partial(_mha_kernel, batch=B, heads=heads,
                               head_size=D, s_q=S_q, s_k=S_k)

    vmem = pl.BlockSpec(memory_space=pltpu.MemorySpace.VMEM)
    out = pl.pallas_call(
        kernel,
        out_shape=jax.ShapeDtypeStruct((B * S_q, E), jnp.float32),
        in_specs=[vmem, vmem, vmem, vmem, vmem, vmem],
        out_specs=vmem,
    )(k2, v2, q2, m2, w_all, b_all)

    return out.reshape(B, S_q, E)


def _reference(k, v, q, mask, params, *, heads):
    """Plain-JAX reference mirroring the PyTorch forward exactly."""
    B, S_k, E = k.shape
    S_q = q.shape[1]
    D = E // heads
    K = k @ params['wk'] + params['bk']
    V = v @ params['wv'] + params['bv']
    Q = q @ params['wq'] + params['bq']
    K = K.reshape(B, S_k, heads, D).transpose(0, 2, 1, 3)
    V = V.reshape(B, S_k, heads, D).transpose(0, 2, 1, 3)
    Q = Q.reshape(B, S_q, heads, D).transpose(0, 2, 1, 3) / math.sqrt(D)
    dot = jnp.einsum('bhqd,bhkd->bhqk', Q, K)
    keep = (mask > 0)[:, None, :, :]
    dot = jnp.where(keep, dot, -jnp.inf)
    attn = jax.nn.softmax(dot, axis=-1)
    ctx = jnp.einsum('bhqk,bhkd->bhqd', attn, V)
    ctx = ctx.transpose(0, 2, 1, 3).reshape(B, S_q, E)
    return ctx @ params['wo'] + params['bo']


if __name__ == "__main__":
    # Module defaults: size=128, heads=4 -> head_size=32. Small batch/seq.
    B, S, E, H = 2, 8, 128, 4

    key = jax.random.PRNGKey(0)
    ks = jax.random.split(key, 12)

    def linear_params(kw, kb, fan_in, fan_out):
        # Mimic nn.Linear's uniform(-1/sqrt(fan_in), 1/sqrt(fan_in)) init.
        bound = 1.0 / math.sqrt(fan_in)
        W = jax.random.uniform(kw, (fan_out, fan_in), jnp.float32, -bound, bound)
        b = jax.random.uniform(kb, (fan_out,), jnp.float32, -bound, bound)
        return W.T, b   # pass W transposed ([in, out]) so kernels do x @ W + b

    wk, bk = linear_params(ks[0], ks[1], E, E)
    wv, bv = linear_params(ks[2], ks[3], E, E)
    wq, bq = linear_params(ks[4], ks[5], E, E)
    wo, bo = linear_params(ks[6], ks[7], E, E)
    params = dict(wk=wk, bk=bk, wv=wv, bv=bv, wq=wq, bq=bq, wo=wo, bo=bo)

    k_in = jax.random.normal(ks[8], (B, S, E), jnp.float32)
    v_in = jax.random.normal(ks[9], (B, S, E), jnp.float32)
    q_in = jax.random.normal(ks[10], (B, S, E), jnp.float32)
    # Boolean key-mask as int32 (1 = attend, 0 = masked); guarantee at least
    # one visible key per batch so the -inf reference is well defined.
    mask = (jax.random.uniform(ks[11], (B, 1, S)) > 0.3).astype(jnp.int32)
    mask = mask.at[:, :, 0].set(1)

    out = self_attention(k_in, v_in, q_in, mask, params, heads=H)
    out = jax.block_until_ready(out)

    ref = _reference(k_in, v_in, q_in, mask, params, heads=H)
    assert out.shape == (B, S, E)
    # Tolerance accounts for the approximate EUP reciprocal used in the softmax
    # normalization; everything else is exact f32.
    assert jnp.allclose(out, ref, atol=1e-2, rtol=1e-2), "mismatch vs reference"

    print("KERNEL_OK")
</pallas_src>

<mosaic_0001>
module attributes {stable_mosaic.version = 11 : i64} {
  func.func @_mha_kernel(%arg0: memref<16x128xf32, #tpu.memory_space<vmem>>, %arg1: memref<16x128xf32, #tpu.memory_space<vmem>>, %arg2: memref<16x128xf32, #tpu.memory_space<vmem>>, %arg3: memref<2x8xi32, #tpu.memory_space<vmem>>, %arg4: memref<4x128x128xf32, #tpu.memory_space<vmem>>, %arg5: memref<4x128xf32, #tpu.memory_space<vmem>>, %arg6: memref<16x128xf32, #tpu.memory_space<vmem>>) attributes {dimension_semantics = [], scalar_prefetch = 0 : i64, scratch_operands = 0 : i64, tpu.core_type = #tpu.core_type<tc>} {
    %c0 = arith.constant 0 : index
    %c0_0 = arith.constant 0 : index
    %c0_1 = arith.constant 0 : index
    %0 = vector.load %arg4[%c0, %c0_0, %c0_1] : memref<4x128x128xf32, #tpu.memory_space<vmem>>, vector<1x128x128xf32>
    %1 = vector.shape_cast %0 : vector<1x128x128xf32> to vector<128x128xf32>
    %c1 = arith.constant 1 : index
    %c0_2 = arith.constant 0 : index
    %c0_3 = arith.constant 0 : index
    %2 = vector.load %arg4[%c1, %c0_2, %c0_3] : memref<4x128x128xf32, #tpu.memory_space<vmem>>, vector<1x128x128xf32>
    %3 = vector.shape_cast %2 : vector<1x128x128xf32> to vector<128x128xf32>
    %c2 = arith.constant 2 : index
    %c0_4 = arith.constant 0 : index
    %c0_5 = arith.constant 0 : index
    %4 = vector.load %arg4[%c2, %c0_4, %c0_5] : memref<4x128x128xf32, #tpu.memory_space<vmem>>, vector<1x128x128xf32>
    %5 = vector.shape_cast %4 : vector<1x128x128xf32> to vector<128x128xf32>
    %c3 = arith.constant 3 : index
    %c0_6 = arith.constant 0 : index
    %c0_7 = arith.constant 0 : index
    %6 = vector.load %arg4[%c3, %c0_6, %c0_7] : memref<4x128x128xf32, #tpu.memory_space<vmem>>, vector<1x128x128xf32>
    %7 = vector.shape_cast %6 : vector<1x128x128xf32> to vector<128x128xf32>
    %c0_8 = arith.constant 0 : index
    %c0_9 = arith.constant 0 : index
    %8 = vector.load %arg5[%c0_8, %c0_9] : memref<4x128xf32, #tpu.memory_space<vmem>>, vector<1x128xf32>
    %c1_10 = arith.constant 1 : index
    %c0_11 = arith.constant 0 : index
    %9 = vector.load %arg5[%c1_10, %c0_11] : memref<4x128xf32, #tpu.memory_space<vmem>>, vector<1x128xf32>
    %c2_12 = arith.constant 2 : index
    %c0_13 = arith.constant 0 : index
    %10 = vector.load %arg5[%c2_12, %c0_13] : memref<4x128xf32, #tpu.memory_space<vmem>>, vector<1x128xf32>
    %c3_14 = arith.constant 3 : index
    %c0_15 = arith.constant 0 : index
    %11 = vector.load %arg5[%c3_14, %c0_15] : memref<4x128xf32, #tpu.memory_space<vmem>>, vector<1x128xf32>
    %c0_16 = arith.constant 0 : index
    %c0_17 = arith.constant 0 : index
    %12 = vector.load %arg0[%c0_16, %c0_17] : memref<16x128xf32, #tpu.memory_space<vmem>>, vector<16x128xf32>
    %cst = arith.constant dense<0.000000e+00> : vector<16x128xf32>
    %13 = tpu.matmul %12, %1, %cst {dimension_numbers = #tpu.dot_dimension_numbers<[1], [0], [0], [1], [0, 0, 1, 1], [], []>} : vector<16x128xf32>, vector<128x128xf32>, vector<16x128xf32> -> vector<16x128xf32>
    %14 = vector.broadcast %8 : vector<1x128xf32> to vector<16x128xf32>
    %15 = arith.addf %13, %14 : vector<16x128xf32>
    %c0_18 = arith.constant 0 : index
    %c0_19 = arith.constant 0 : index
    %16 = vector.load %arg1[%c0_18, %c0_19] : memref<16x128xf32, #tpu.memory_space<vmem>>, vector<16x128xf32>
    %cst_20 = arith.constant dense<0.000000e+00> : vector<16x128xf32>
    %17 = tpu.matmul %16, %3, %cst_20 {dimension_numbers = #tpu.dot_dimension_numbers<[1], [0], [0], [1], [0, 0, 1, 1], [], []>} : vector<16x128xf32>, vector<128x128xf32>, vector<16x128xf32> -> vector<16x128xf32>
    %18 = vector.broadcast %9 : vector<1x128xf32> to vector<16x128xf32>
    %19 = arith.addf %17, %18 : vector<16x128xf32>
    %c0_21 = arith.constant 0 : index
    %c0_22 = arith.constant 0 : index
    %20 = vector.load %arg2[%c0_21, %c0_22] : memref<16x128xf32, #tpu.memory_space<vmem>>, vector<16x128xf32>
    %cst_23 = arith.constant dense<0.000000e+00> : vector<16x128xf32>
    %21 = tpu.matmul %20, %5, %cst_23 {dimension_numbers = #tpu.dot_dimension_numbers<[1], [0], [0], [1], [0, 0, 1, 1], [], []>} : vector<16x128xf32>, vector<128x128xf32>, vector<16x128xf32> -> vector<16x128xf32>
    %22 = vector.broadcast %10 : vector<1x128xf32> to vector<16x128xf32>
    %23 = arith.addf %21, %22 : vector<16x128xf32>
    %c0_24 = arith.constant 0 : index
    %c0_25 = arith.constant 0 : index
    %24 = vector.load %arg3[%c0_24, %c0_25] : memref<2x8xi32, #tpu.memory_space<vmem>>, vector<2x8xi32>
    %25 = arith.sitofp %24 : vector<2x8xi32> to vector<2x8xf32>
    %cst_26 = arith.constant 1.000000e+00 : f32
    %26 = vector.broadcast %cst_26 : f32 to vector<2x8xf32>
    %27 = arith.subf %26, %25 : vector<2x8xf32>
    %cst_27 = arith.constant -1.000000e+30 : f32
    %28 = vector.broadcast %cst_27 : f32 to vector<2x8xf32>
    %29 = arith.mulf %27, %28 : vector<2x8xf32>
    %30 = vector.extract_strided_slice %15 {offsets = [0, 0], sizes = [8, 128], strides = [1, 1]} : vector<16x128xf32> to vector<8x128xf32>
    %31 = vector.extract_strided_slice %19 {offsets = [0, 0], sizes = [8, 128], strides = [1, 1]} : vector<16x128xf32> to vector<8x128xf32>
    %32 = vector.extract_strided_slice %23 {offsets = [0, 0], sizes = [8, 128], strides = [1, 1]} : vector<16x128xf32> to vector<8x128xf32>
    %33 = vector.extract_strided_slice %29 {offsets = [0, 0], sizes = [1, 8], strides = [1, 1]} : vector<2x8xf32> to vector<1x8xf32>
    %34 = vector.extract_strided_slice %32 {offsets = [0, 0], sizes = [8, 32], strides = [1, 1]} : vector<8x128xf32> to vector<8x32xf32>
    %35 = vector.extract_strided_slice %30 {offsets = [0, 0], sizes = [8, 32], strides = [1, 1]} : vector<8x128xf32> to vector<8x32xf32>
    %36 = vector.extract_strided_slice %31 {offsets = [0, 0], sizes = [8, 32], strides = [1, 1]} : vector<8x128xf32> to vector<8x32xf32>
    %cst_28 = arith.constant dense<0.000000e+00> : vector<8x8xf32>
    %37 = tpu.matmul %34, %35, %cst_28 {dimension_numbers = #tpu.dot_dimension_numbers<[1], [1], [0], [0], [0, 0, 1, 0], [], []>} : vector<8x32xf32>, vector<8x32xf32>, vector<8x8xf32> -> vector<8x8xf32>
    %38 = vector.broadcast %33 : vector<1x8xf32> to vector<8x8xf32>
    %39 = arith.addf %37, %38 : vector<8x8xf32>
    %cst_29 = arith.constant dense<0xFF800000> : vector<8xf32>
    %40 = vector.multi_reduction <maximumf>, %39, %cst_29 [1] : vector<8x8xf32> to vector<8xf32>
    %41 = vector.shape_cast %40 : vector<8xf32> to vector<8x1xf32>
    %42 = vector.broadcast %41 : vector<8x1xf32> to vector<8x8xf32>
    %43 = arith.subf %39, %42 : vector<8x8xf32>
    %44 = math.exp %43 : vector<8x8xf32>
    %cst_30 = arith.constant dense<0.000000e+00> : vector<8xf32>
    %45 = vector.multi_reduction <add>, %44, %cst_30 [1] : vector<8x8xf32> to vector<8xf32>
    %46 = vector.shape_cast %45 : vector<8xf32> to vector<8x1xf32>
    %47 = tpu.reciprocal %46 {approx = true} : vector<8x1xf32> -> vector<8x1xf32>
    %48 = vector.broadcast %47 : vector<8x1xf32> to vector<8x8xf32>
    %49 = arith.mulf %44, %48 : vector<8x8xf32>
    %cst_31 = arith.constant dense<0.000000e+00> : vector<8x32xf32>
    %50 = tpu.matmul %49, %36, %cst_31 {dimension_numbers = #tpu.dot_dimension_numbers<[1], [0], [0], [1], [0, 0, 1, 1], [], []>} : vector<8x8xf32>, vector<8x32xf32>, vector<8x32xf32> -> vector<8x32xf32>
    %51 = vector.extract_strided_slice %32 {offsets = [0, 32], sizes = [8, 32], strides = [1, 1]} : vector<8x128xf32> to vector<8x32xf32>
    %52 = vector.extract_strided_slice %30 {offsets = [0, 32], sizes = [8, 32], strides = [1, 1]} : vector<8x128xf32> to vector<8x32xf32>
    %53 = vector.extract_strided_slice %31 {offsets = [0, 32], sizes = [8, 32], strides = [1, 1]} : vector<8x128xf32> to vector<8x32xf32>
    %cst_32 = arith.constant dense<0.000000e+00> : vector<8x8xf32>
    %54 = tpu.matmul %51, %52, %cst_32 {dimension_numbers = #tpu.dot_dimension_numbers<[1], [1], [0], [0], [0, 0, 1, 0], [], []>} : vector<8x32xf32>, vector<8x32xf32>, vector<8x8xf32> -> vector<8x8xf32>
    %55 = vector.broadcast %33 : vector<1x8xf32> to vector<8x8xf32>
    %56 = arith.addf %54, %55 : vector<8x8xf32>
    %cst_33 = arith.constant dense<0xFF800000> : vector<8xf32>
    %57 = vector.multi_reduction <maximumf>, %56, %cst_33 [1] : vector<8x8xf32> to vector<8xf32>
    %58 = vector.shape_cast %57 : vector<8xf32> to vector<8x1xf32>
    %59 = vector.broadcast %58 : vector<8x1xf32> to vector<8x8xf32>
    %60 = arith.subf %56, %59 : vector<8x8xf32>
    %61 = math.exp %60 : vector<8x8xf32>
    %cst_34 = arith.constant dense<0.000000e+00> : vector<8xf32>
    %62 = vector.multi_reduction <add>, %61, %cst_34 [1] : vector<8x8xf32> to vector<8xf32>
    %63 = vector.shape_cast %62 : vector<8xf32> to vector<8x1xf32>
    %64 = tpu.reciprocal %63 {approx = true} : vector<8x1xf32> -> vector<8x1xf32>
    %65 = vector.broadcast %64 : vector<8x1xf32> to vector<8x8xf32>
    %66 = arith.mulf %61, %65 : vector<8x8xf32>
    %cst_35 = arith.constant dense<0.000000e+00> : vector<8x32xf32>
    %67 = tpu.matmul %66, %53, %cst_35 {dimension_numbers = #tpu.dot_dimension_numbers<[1], [0], [0], [1], [0, 0, 1, 1], [], []>} : vector<8x8xf32>, vector<8x32xf32>, vector<8x32xf32> -> vector<8x32xf32>
    %68 = vector.extract_strided_slice %32 {offsets = [0, 64], sizes = [8, 32], strides = [1, 1]} : vector<8x128xf32> to vector<8x32xf32>
    %69 = vector.extract_strided_slice %30 {offsets = [0, 64], sizes = [8, 32], strides = [1, 1]} : vector<8x128xf32> to vector<8x32xf32>
    %70 = vector.extract_strided_slice %31 {offsets = [0, 64], sizes = [8, 32], strides = [1, 1]} : vector<8x128xf32> to vector<8x32xf32>
    %cst_36 = arith.constant dense<0.000000e+00> : vector<8x8xf32>
    %71 = tpu.matmul %68, %69, %cst_36 {dimension_numbers = #tpu.dot_dimension_numbers<[1], [1], [0], [0], [0, 0, 1, 0], [], []>} : vector<8x32xf32>, vector<8x32xf32>, vector<8x8xf32> -> vector<8x8xf32>
    %72 = vector.broadcast %33 : vector<1x8xf32> to vector<8x8xf32>
    %73 = arith.addf %71, %72 : vector<8x8xf32>
    %cst_37 = arith.constant dense<0xFF800000> : vector<8xf32>
    %74 = vector.multi_reduction <maximumf>, %73, %cst_37 [1] : vector<8x8xf32> to vector<8xf32>
    %75 = vector.shape_cast %74 : vector<8xf32> to vector<8x1xf32>
    %76 = vector.broadcast %75 : vector<8x1xf32> to vector<8x8xf32>
    %77 = arith.subf %73, %76 : vector<8x8xf32>
    %78 = math.exp %77 : vector<8x8xf32>
    %cst_38 = arith.constant dense<0.000000e+00> : vector<8xf32>
    %79 = vector.multi_reduction <add>, %78, %cst_38 [1] : vector<8x8xf32> to vector<8xf32>
    %80 = vector.shape_cast %79 : vector<8xf32> to vector<8x1xf32>
    %81 = tpu.reciprocal %80 {approx = true} : vector<8x1xf32> -> vector<8x1xf32>
    %82 = vector.broadcast %81 : vector<8x1xf32> to vector<8x8xf32>
    %83 = arith.mulf %78, %82 : vector<8x8xf32>
    %cst_39 = arith.constant dense<0.000000e+00> : vector<8x32xf32>
    %84 = tpu.matmul %83, %70, %cst_39 {dimension_numbers = #tpu.dot_dimension_numbers<[1], [0], [0], [1], [0, 0, 1, 1], [], []>} : vector<8x8xf32>, vector<8x32xf32>, vector<8x32xf32> -> vector<8x32xf32>
    %85 = vector.extract_strided_slice %32 {offsets = [0, 96], sizes = [8, 32], strides = [1, 1]} : vector<8x128xf32> to vector<8x32xf32>
    %86 = vector.extract_strided_slice %30 {offsets = [0, 96], sizes = [8, 32], strides = [1, 1]} : vector<8x128xf32> to vector<8x32xf32>
    %87 = vector.extract_strided_slice %31 {offsets = [0, 96], sizes = [8, 32], strides = [1, 1]} : vector<8x128xf32> to vector<8x32xf32>
    %cst_40 = arith.constant dense<0.000000e+00> : vector<8x8xf32>
    %88 = tpu.matmul %85, %86, %cst_40 {dimension_numbers = #tpu.dot_dimension_numbers<[1], [1], [0], [0], [0, 0, 1, 0], [], []>} : vector<8x32xf32>, vector<8x32xf32>, vector<8x8xf32> -> vector<8x8xf32>
    %89 = vector.broadcast %33 : vector<1x8xf32> to vector<8x8xf32>
    %90 = arith.addf %88, %89 : vector<8x8xf32>
    %cst_41 = arith.constant dense<0xFF800000> : vector<8xf32>
    %91 = vector.multi_reduction <maximumf>, %90, %cst_41 [1] : vector<8x8xf32> to vector<8xf32>
    %92 = vector.shape_cast %91 : vector<8xf32> to vector<8x1xf32>
    %93 = vector.broadcast %92 : vector<8x1xf32> to vector<8x8xf32>
    %94 = arith.subf %90, %93 : vector<8x8xf32>
    %95 = math.exp %94 : vector<8x8xf32>
    %cst_42 = arith.constant dense<0.000000e+00> : vector<8xf32>
    %96 = vector.multi_reduction <add>, %95, %cst_42 [1] : vector<8x8xf32> to vector<8xf32>
    %97 = vector.shape_cast %96 : vector<8xf32> to vector<8x1xf32>
    %98 = tpu.reciprocal %97 {approx = true} : vector<8x1xf32> -> vector<8x1xf32>
    %99 = vector.broadcast %98 : vector<8x1xf32> to vector<8x8xf32>
    %100 = arith.mulf %95, %99 : vector<8x8xf32>
    %cst_43 = arith.constant dense<0.000000e+00> : vector<8x32xf32>
    %101 = tpu.matmul %100, %87, %cst_43 {dimension_numbers = #tpu.dot_dimension_numbers<[1], [0], [0], [1], [0, 0, 1, 1], [], []>} : vector<8x8xf32>, vector<8x32xf32>, vector<8x32xf32> -> vector<8x32xf32>
    %102 = tpu.concatenate %50, %67, %84, %101 in 1 : vector<8x32xf32>, vector<8x32xf32>, vector<8x32xf32>, vector<8x32xf32> -> vector<8x128xf32>
    %103 = vector.extract_strided_slice %15 {offsets = [8, 0], sizes = [8, 128], strides = [1, 1]} : vector<16x128xf32> to vector<8x128xf32>
    %104 = vector.extract_strided_slice %19 {offsets = [8, 0], sizes = [8, 128], strides = [1, 1]} : vector<16x128xf32> to vector<8x128xf32>
    %105 = vector.extract_strided_slice %23 {offsets = [8, 0], sizes = [8, 128], strides = [1, 1]} : vector<16x128xf32> to vector<8x128xf32>
    %106 = vector.extract_strided_slice %29 {offsets = [1, 0], sizes = [1, 8], strides = [1, 1]} : vector<2x8xf32> to vector<1x8xf32>
    %107 = vector.extract_strided_slice %105 {offsets = [0, 0], sizes = [8, 32], strides = [1, 1]} : vector<8x128xf32> to vector<8x32xf32>
    %108 = vector.extract_strided_slice %103 {offsets = [0, 0], sizes = [8, 32], strides = [1, 1]} : vector<8x128xf32> to vector<8x32xf32>
    %109 = vector.extract_strided_slice %104 {offsets = [0, 0], sizes = [8, 32], strides = [1, 1]} : vector<8x128xf32> to vector<8x32xf32>
    %cst_44 = arith.constant dense<0.000000e+00> : vector<8x8xf32>
    %110 = tpu.matmul %107, %108, %cst_44 {dimension_numbers = #tpu.dot_dimension_numbers<[1], [1], [0], [0], [0, 0, 1, 0], [], []>} : vector<8x32xf32>, vector<8x32xf32>, vector<8x8xf32> -> vector<8x8xf32>
    %111 = vector.broadcast %106 : vector<1x8xf32> to vector<8x8xf32>
    %112 = arith.addf %110, %111 : vector<8x8xf32>
    %cst_45 = arith.constant dense<0xFF800000> : vector<8xf32>
    %113 = vector.multi_reduction <maximumf>, %112, %cst_45 [1] : vector<8x8xf32> to vector<8xf32>
    %114 = vector.shape_cast %113 : vector<8xf32> to vector<8x1xf32>
    %115 = vector.broadcast %114 : vector<8x1xf32> to vector<8x8xf32>
    %116 = arith.subf %112, %115 : vector<8x8xf32>
    %117 = math.exp %116 : vector<8x8xf32>
    %cst_46 = arith.constant dense<0.000000e+00> : vector<8xf32>
    %118 = vector.multi_reduction <add>, %117, %cst_46 [1] : vector<8x8xf32> to vector<8xf32>
    %119 = vector.shape_cast %118 : vector<8xf32> to vector<8x1xf32>
    %120 = tpu.reciprocal %119 {approx = true} : vector<8x1xf32> -> vector<8x1xf32>
    %121 = vector.broadcast %120 : vector<8x1xf32> to vector<8x8xf32>
    %122 = arith.mulf %117, %121 : vector<8x8xf32>
    %cst_47 = arith.constant dense<0.000000e+00> : vector<8x32xf32>
    %123 = tpu.matmul %122, %109, %cst_47 {dimension_numbers = #tpu.dot_dimension_numbers<[1], [0], [0], [1], [0, 0, 1, 1], [], []>} : vector<8x8xf32>, vector<8x32xf32>, vector<8x32xf32> -> vector<8x32xf32>
    %124 = vector.extract_strided_slice %105 {offsets = [0, 32], sizes = [8, 32], strides = [1, 1]} : vector<8x128xf32> to vector<8x32xf32>
    %125 = vector.extract_strided_slice %103 {offsets = [0, 32], sizes = [8, 32], strides = [1, 1]} : vector<8x128xf32> to vector<8x32xf32>
    %126 = vector.extract_strided_slice %104 {offsets = [0, 32], sizes = [8, 32], strides = [1, 1]} : vector<8x128xf32> to vector<8x32xf32>
    %cst_48 = arith.constant dense<0.000000e+00> : vector<8x8xf32>
    %127 = tpu.matmul %124, %125, %cst_48 {dimension_numbers = #tpu.dot_dimension_numbers<[1], [1], [0], [0], [0, 0, 1, 0], [], []>} : vector<8x32xf32>, vector<8x32xf32>, vector<8x8xf32> -> vector<8x8xf32>
    %128 = vector.broadcast %106 : vector<1x8xf32> to vector<8x8xf32>
    %129 = arith.addf %127, %128 : vector<8x8xf32>
    %cst_49 = arith.constant dense<0xFF800000> : vector<8xf32>
    %130 = vector.multi_reduction <maximumf>, %129, %cst_49 [1] : vector<8x8xf32> to vector<8xf32>
    %131 = vector.shape_cast %130 : vector<8xf32> to vector<8x1xf32>
    %132 = vector.broadcast %131 : vector<8x1xf32> to vector<8x8xf32>
    %133 = arith.subf %129, %132 : vector<8x8xf32>
    %134 = math.exp %133 : vector<8x8xf32>
    %cst_50 = arith.constant dense<0.000000e+00> : vector<8xf32>
    %135 = vector.multi_reduction <add>, %134, %cst_50 [1] : vector<8x8xf32> to vector<8xf32>
    %136 = vector.shape_cast %135 : vector<8xf32> to vector<8x1xf32>
    %137 = tpu.reciprocal %136 {approx = true} : vector<8x1xf32> -> vector<8x1xf32>
    %138 = vector.broadcast %137 : vector<8x1xf32> to vector<8x8xf32>
    %139 = arith.mulf %134, %138 : vector<8x8xf32>
    %cst_51 = arith.constant dense<0.000000e+00> : vector<8x32xf32>
    %140 = tpu.matmul %139, %126, %cst_51 {dimension_numbers = #tpu.dot_dimension_numbers<[1], [0], [0], [1], [0, 0, 1, 1], [], []>} : vector<8x8xf32>, vector<8x32xf32>, vector<8x32xf32> -> vector<8x32xf32>
    %141 = vector.extract_strided_slice %105 {offsets = [0, 64], sizes = [8, 32], strides = [1, 1]} : vector<8x128xf32> to vector<8x32xf32>
    %142 = vector.extract_strided_slice %103 {offsets = [0, 64], sizes = [8, 32], strides = [1, 1]} : vector<8x128xf32> to vector<8x32xf32>
    %143 = vector.extract_strided_slice %104 {offsets = [0, 64], sizes = [8, 32], strides = [1, 1]} : vector<8x128xf32> to vector<8x32xf32>
    %cst_52 = arith.constant dense<0.000000e+00> : vector<8x8xf32>
    %144 = tpu.matmul %141, %142, %cst_52 {dimension_numbers = #tpu.dot_dimension_numbers<[1], [1], [0], [0], [0, 0, 1, 0], [], []>} : vector<8x32xf32>, vector<8x32xf32>, vector<8x8xf32> -> vector<8x8xf32>
    %145 = vector.broadcast %106 : vector<1x8xf32> to vector<8x8xf32>
    %146 = arith.addf %144, %145 : vector<8x8xf32>
    %cst_53 = arith.constant dense<0xFF800000> : vector<8xf32>
    %147 = vector.multi_reduction <maximumf>, %146, %cst_53 [1] : vector<8x8xf32> to vector<8xf32>
    %148 = vector.shape_cast %147 : vector<8xf32> to vector<8x1xf32>
    %149 = vector.broadcast %148 : vector<8x1xf32> to vector<8x8xf32>
    %150 = arith.subf %146, %149 : vector<8x8xf32>
    %151 = math.exp %150 : vector<8x8xf32>
    %cst_54 = arith.constant dense<0.000000e+00> : vector<8xf32>
    %152 = vector.multi_reduction <add>, %151, %cst_54 [1] : vector<8x8xf32> to vector<8xf32>
    %153 = vector.shape_cast %152 : vector<8xf32> to vector<8x1xf32>
    %154 = tpu.reciprocal %153 {approx = true} : vector<8x1xf32> -> vector<8x1xf32>
    %155 = vector.broadcast %154 : vector<8x1xf32> to vector<8x8xf32>
    %156 = arith.mulf %151, %155 : vector<8x8xf32>
    %cst_55 = arith.constant dense<0.000000e+00> : vector<8x32xf32>
    %157 = tpu.matmul %156, %143, %cst_55 {dimension_numbers = #tpu.dot_dimension_numbers<[1], [0], [0], [1], [0, 0, 1, 1], [], []>} : vector<8x8xf32>, vector<8x32xf32>, vector<8x32xf32> -> vector<8x32xf32>
    %158 = vector.extract_strided_slice %105 {offsets = [0, 96], sizes = [8, 32], strides = [1, 1]} : vector<8x128xf32> to vector<8x32xf32>
    %159 = vector.extract_strided_slice %103 {offsets = [0, 96], sizes = [8, 32], strides = [1, 1]} : vector<8x128xf32> to vector<8x32xf32>
    %160 = vector.extract_strided_slice %104 {offsets = [0, 96], sizes = [8, 32], strides = [1, 1]} : vector<8x128xf32> to vector<8x32xf32>
    %cst_56 = arith.constant dense<0.000000e+00> : vector<8x8xf32>
    %161 = tpu.matmul %158, %159, %cst_56 {dimension_numbers = #tpu.dot_dimension_numbers<[1], [1], [0], [0], [0, 0, 1, 0], [], []>} : vector<8x32xf32>, vector<8x32xf32>, vector<8x8xf32> -> vector<8x8xf32>
    %162 = vector.broadcast %106 : vector<1x8xf32> to vector<8x8xf32>
    %163 = arith.addf %161, %162 : vector<8x8xf32>
    %cst_57 = arith.constant dense<0xFF800000> : vector<8xf32>
    %164 = vector.multi_reduction <maximumf>, %163, %cst_57 [1] : vector<8x8xf32> to vector<8xf32>
    %165 = vector.shape_cast %164 : vector<8xf32> to vector<8x1xf32>
    %166 = vector.broadcast %165 : vector<8x1xf32> to vector<8x8xf32>
    %167 = arith.subf %163, %166 : vector<8x8xf32>
    %168 = math.exp %167 : vector<8x8xf32>
    %cst_58 = arith.constant dense<0.000000e+00> : vector<8xf32>
    %169 = vector.multi_reduction <add>, %168, %cst_58 [1] : vector<8x8xf32> to vector<8xf32>
    %170 = vector.shape_cast %169 : vector<8xf32> to vector<8x1xf32>
    %171 = tpu.reciprocal %170 {approx = true} : vector<8x1xf32> -> vector<8x1xf32>
    %172 = vector.broadcast %171 : vector<8x1xf32> to vector<8x8xf32>
    %173 = arith.mulf %168, %172 : vector<8x8xf32>
    %cst_59 = arith.constant dense<0.000000e+00> : vector<8x32xf32>
    %174 = tpu.matmul %173, %160, %cst_59 {dimension_numbers = #tpu.dot_dimension_numbers<[1], [0], [0], [1], [0, 0, 1, 1], [], []>} : vector<8x8xf32>, vector<8x32xf32>, vector<8x32xf32> -> vector<8x32xf32>
    %175 = tpu.concatenate %123, %140, %157, %174 in 1 : vector<8x32xf32>, vector<8x32xf32>, vector<8x32xf32>, vector<8x32xf32> -> vector<8x128xf32>
    %176 = tpu.concatenate %102, %175 in 0 : vector<8x128xf32>, vector<8x128xf32> -> vector<16x128xf32>
    %cst_60 = arith.constant dense<0.000000e+00> : vector<16x128xf32>
    %177 = tpu.matmul %176, %7, %cst_60 {dimension_numbers = #tpu.dot_dimension_numbers<[1], [0], [0], [1], [0, 0, 1, 1], [], []>} : vector<16x128xf32>, vector<128x128xf32>, vector<16x128xf32> -> vector<16x128xf32>
    %178 = vector.broadcast %11 : vector<1x128xf32> to vector<16x128xf32>
    %179 = arith.addf %177, %178 : vector<16x128xf32>
    %c0_61 = arith.constant 0 : index
    %c0_62 = arith.constant 0 : index
    %180 = vector.load %arg6[%c0_61, %c0_62] : memref<16x128xf32, #tpu.memory_space<vmem>>, vector<16x128xf32>
    tpu.vector_store %arg6[%c0_61, %c0_62], %179 {strides = array<i32>} : memref<16x128xf32, #tpu.memory_space<vmem>>, vector<16x128xf32>,
    return
  }
}

</mosaic_0001>

<bundles_post_ra>
// kernel: tpu_custom_call.1
= control target key start
LH: loop header
LB: loop body
LE: loop exit
PB: predicated region body
PF: predicated region fallthrough
CT: control target
= control target key end

     0   :  { %11 = vsyncpa [#allocation3], 0  ;;  %s2841_s0 = inlined_call_operand.hbm [shape: f32[16,128], index: 0, kind: input, shape index: {}]   ;;  %s2842_s1 = inlined_call_operand.hbm [shape: f32[16,128], index: 1, kind: input, shape index: {}]   ;;  %s2843_s2 = inlined_call_operand.hbm [shape: f32[16,128], index: 2, kind: input, shape index: {}]   ;;  %s2844_s3 = inlined_call_operand.vmem [shape: s32[2,8], index: 3, kind: input, shape index: {}]   ;;  %s2845_s4 = inlined_call_operand.hbm [shape: f32[4,128,128], index: 4, kind: input, shape index: {}]   ;;  %s2846_s5 = inlined_call_operand.vmem [shape: f32[4,128], index: 5, kind: input, shape index: {}]   ;;  %s2847_s6 = inlined_call_operand.hbm [shape: f32[16,128], index: 6, kind: output, shape index: {}]  }
   0x1   :  { %12 = vsyncpa [#allocation6], 0 }
   0x2   :  { %13 = vsyncpa [#allocation9], 0 }
   0x3   :  { %14 = vsyncpa [#allocation4], 0  ;;  %s2508_s21 = smov [#allocation5]   ;;  %s2509_s23 = smov [#allocation2]  }
   0x4   :  { %s32_s22 = sshll.u32 %s2508_s21, 4  ;;  %s20_s24 = sshll.u32 %s2509_s23, 4  ;;  %s33_s22 = int_to_ptr.vmem [resolvable:$true] %s32_s22  ;;  %s2555_s24 = int_to_ptr.vmem [resolvable:$true] %s20_s24 }
   0x5   :  { %s2390_s27 = scalar_lea.hbm %s2842_s1, 256 }
   0x6   :  { %p2391_p0 = scmp.ne.s32.totalorder %s2842_s1, %s2390_s27  ;;  %p2394_p1 = scmp.lt.u32.totalorder %s2390_s27, %s2842_s1 }
   0x8   :  { %p2396_p2 = pnand %p2394_p1, %p2391_p0 }
   0xa   :  { %2399 = shalt.err (!%p2396_p2)
}
   0xb   :  { %s2400_s8 = scalar_lea.vmem %s33_s22, 256  ;;  %p2405_p4 = scmp.lt.s32.totalorder %s33_s22, %s33_s22 }
   0xc   :  { %p2401_p3 = scmp.ne.s32.totalorder %s33_s22, %s2400_s8  ;;  %p2406_p5 = scmp.lt.s32.totalorder %s2400_s8, %s2400_s8 }
   0xe   :  { %p2407_p6 = por %p2406_p5, %p2405_p4 }
  0x10   :  { %p2408_p7 = pnand %p2407_p6, %p2401_p3 }
  0x12   :  { %2411 = shalt.err (!%p2408_p7)
}
  0x13   :  { %s2510_s9 = smov 128   ;;  %s2511_s10 = smov 8  }
  0x14   :  { %38 = dma.hbm_to_vmem [thread:$0]  %s2842_s1, 256, %s33_s22, [#allocation6], %s2510_s9, %s2510_s9, %s2511_s10  }
  0x15   :  { %s2412_s15 = scalar_lea.hbm %s2841_s0, 256 }
  0x16   :  { %p2413_p8 = scmp.ne.s32.totalorder %s2841_s0, %s2412_s15  ;;  %p2416_p9 = scmp.lt.u32.totalorder %s2412_s15, %s2841_s0 }
  0x18   :  { %p2418_p10 = pnand %p2416_p9, %p2413_p8 }
  0x1a   :  { %2421 = shalt.err (!%p2418_p10)
}
  0x1b   :  { %s2422_s20 = scalar_lea.vmem %s2555_s24, 256  ;;  %p2427_p12 = scmp.lt.s32.totalorder %s2555_s24, %s2555_s24 }
  0x1c   :  { %p2423_p11 = scmp.ne.s32.totalorder %s2555_s24, %s2422_s20  ;;  %p2428_p13 = scmp.lt.s32.totalorder %s2422_s20, %s2422_s20 }
  0x1e   :  { %p2429_p0 = por %p2428_p13, %p2427_p12 }
  0x20   :  { %p2430_p1 = pnand %p2429_p0, %p2423_p11 }
  0x22   :  { %2433 = shalt.err (!%p2430_p1)
}
  0x23   :  { %26 = dma.hbm_to_vmem [thread:$0]  %s2841_s0, 256, %s2555_s24, [#allocation3], %s2510_s9, %s2510_s9, %s2511_s10  }
  0x24   :  { %s2512_s22 = smov [#allocation7]   ;;  %s2513_s25 = smov [#allocation8]  }
  0x25   :  { %s44_s23 = sshll.u32 %s2512_s22, 4  ;;  %s58_s26 = sshll.u32 %s2513_s25, 4  ;;  %s45_s23 = int_to_ptr.vmem [resolvable:$true] %s44_s23  ;;  %s2592_s26 = int_to_ptr.vmem [resolvable:$true] %s58_s26 }
  0x26   :  { %s2434_s29 = scalar_lea.hbm %s2843_s2, 256 }
  0x27   :  { %p2435_p2 = scmp.ne.s32.totalorder %s2843_s2, %s2434_s29  ;;  %p2438_p3 = scmp.lt.u32.totalorder %s2434_s29, %s2843_s2 }
  0x29   :  { %p2440_p4 = pnand %p2438_p3, %p2435_p2 }
  0x2b   :  { %2443 = shalt.err (!%p2440_p4)
}
  0x2c   :  { %s2444_s0 = scalar_lea.vmem %s45_s23, 256  ;;  %p2449_p6 = scmp.lt.s32.totalorder %s45_s23, %s45_s23 }
  0x2d   :  { %p2445_p5 = scmp.ne.s32.totalorder %s45_s23, %s2444_s0  ;;  %p2450_p7 = scmp.lt.s32.totalorder %s2444_s0, %s2444_s0 }
  0x2f   :  { %p2451_p8 = por %p2450_p7, %p2449_p6 }
  0x31   :  { %p2452_p9 = pnand %p2451_p8, %p2445_p5 }
  0x33   :  { %2455 = shalt.err (!%p2452_p9)
}
  0x34   :  { %50 = dma.hbm_to_vmem [thread:$0]  %s2843_s2, 256, %s45_s23, [#allocation6], %s2510_s9, %s2510_s9, %s2511_s10  }
  0x35   :  { %s2456_s15 = scalar_lea.hbm %s2845_s4, 8192 }
  0x36   :  { %p2457_p10 = scmp.ne.s32.totalorder %s2845_s4, %s2456_s15  ;;  %p2460_p11 = scmp.lt.u32.totalorder %s2456_s15, %s2845_s4 }
  0x38   :  { %p2462_p12 = pnand %p2460_p11, %p2457_p10 }
  0x3a   :  { %2465 = shalt.err (!%p2462_p12)
}
  0x3b   :  { %s2466_s20 = scalar_lea.vmem %s2592_s26, 8192  ;;  %p2471_p0 = scmp.lt.s32.totalorder %s2592_s26, %s2592_s26 }
  0x3c   :  { %p2467_p13 = scmp.ne.s32.totalorder %s2592_s26, %s2466_s20  ;;  %p2472_p1 = scmp.lt.s32.totalorder %s2466_s20, %s2466_s20 }
  0x3e   :  { %p2473_p2 = por %p2472_p1, %p2471_p0 }
  0x40   :  { %p2474_p3 = pnand %p2473_p2, %p2467_p13 }
  0x42   :  { %2477 = shalt.err (!%p2474_p3)
}
  0x43   :  { %64 = dma.hbm_to_vmem [thread:$0]  %s2845_s4, 8192, %s2592_s26, [#allocation9], %s2510_s9, %s2510_s9, %s2511_s10  }
  0x44   :  { %2500 = dma.done.wait [#allocation3], 256  }
  0x45   :  { %2501 = vsyncadd [#allocation3], 4294967040 }
  0x46   :  { %2502 = dma.done.wait [#allocation6], 512  }
  0x47   :  { %2503 = vsyncadd [#allocation6], 4294966784 }
  0x48   :  { %2504 = dma.done.wait [#allocation9], 8192  }
  0x49   :  { %2505 = vsyncadd [#allocation9], 4294959104  ;;  %v79_v0 = vld [vmem:[#allocation8] sm:$0xff]  ;;  %v80_v1 = vld [vmem:[#allocation8 + $0x8] sm:$0xff]  ;;  %vm2515_vm0 = vmmov 0   ;;  %vm401_vm1 = vcmask 261120  }
  0x4a   :  { %v81_v2 = vld [vmem:[#allocation8 + $0x10] sm:$0xff]  ;;  %v2203_v3 = vpack.c.bf16 %v80_v1, %v79_v0  ;;  %v82_v4 = vld [vmem:[#allocation8 + $0x18] sm:$0xff]  ;;  %v83_v6 = vld [vmem:[#allocation8 + $0x20] sm:$0xff]  ;;  %s2516_s22 = smov 96   ;;  %vm478_vm2 = vcmask 64512   ;;  %s2518_s30 = smov 32  }
  0x4b   :  { %v2207_v5 = vpack.c.bf16 %v82_v4, %v81_v2  ;;  %v84_v7 = vld [vmem:[#allocation8 + $0x28] sm:$0xff]  ;;  %v150_v9 = vld [vmem:[#allocation2] sm:$0xff]  ;;  %v86_v11 = vld [vmem:[#allocation8 + $0x38] sm:$0xff]  ;;  %vm1072_vm3 = vcmask 523264   ;;  %vm1074_vm4 = vcmask 785408   ;;  %s2519_s11 = smov [#allocation10]  }
  0x4c   :  { %2204 = vmatprep.subr.bf16.mxu0 %v2203_v3  ;;  %v2211_v8 = vpack.c.bf16 %v84_v7, %v83_v6  ;;  %v85_v10 = vld [vmem:[#allocation8 + $0x30] sm:$0xff]  ;;  %2015 = vmatprep.mubr.f32.mxu0 %v150_v9  ;;  %v87_v13 = vld [vmem:[#allocation8 + $0x40] sm:$0xff]  ;;  %v88_v14 = vld [vmem:[#allocation8 + $0x48] sm:$0xff]  ;;  %s1837_s0 = sshll.u32 %s2519_s11, 4  ;;  %s1838_s0 = int_to_ptr.vmem [resolvable:$true] %s1837_s0 }
  0x4d   :  { %2206 = vmatpush3.bf16.msra.mxu0 %v2203_v3  ;;  %v2215_v12 = vpack.c.bf16 %v86_v11, %v85_v10  ;;  %v96_v15 = vld [vmem:[#allocation8 + $0x80] sm:$0xff]  ;;  %v97_v16 = vld [vmem:[#allocation8 + $0x88] sm:$0xff]  ;;  %v98_v17 = vld [vmem:[#allocation8 + $0x90] sm:$0xff]  ;;  %v2219_v18 = vpack.c.bf16 %v88_v14, %v87_v13  ;;  %v2514_v14 = vmov 0.0   ;;  %s2478_s24 = scalar_lea.vmem %s1838_s0, 256  ;;  %p2483_p5 = scmp.lt.s32.totalorder %s1838_s0, %s1838_s0 }
  0x4e   :  { %2208 = vmatprep.subr.bf16.mxu0 %v2207_v5  ;;  %v89_v19 = vld [vmem:[#allocation8 + $0x50] sm:$0xff]  ;;  %v2235_v20 = vpack.c.bf16 %v97_v16, %v96_v15  ;;  %v99_v21 = vld [vmem:[#allocation8 + $0x98] sm:$0xff]  ;;  %v100_v24 = vld [vmem:[#allocation8 + $0xa0] sm:$0xff]  ;;  %p2479_p4 = scmp.ne.s32.totalorder %s1838_s0, %s2478_s24  ;;  %p2484_p6 = scmp.lt.s32.totalorder %s2478_s24, %s2478_s24 }
  0x4f   :  { %v90_v22 = vld [vmem:[#allocation8 + $0x58] sm:$0xff]  ;;  %v2239_v23 = vpack.c.bf16 %v99_v21, %v98_v17  ;;  %v101_v25 = vld [vmem:[#allocation8 + $0xa8] sm:$0xff]  ;;  %v91_v27 = vld [vmem:[#allocation8 + $0x60] sm:$0xff] }
  0x50   :  { %2236 = vmatprep.subr.bf16.mxu1 %v2235_v20  ;;  %v2223_v26 = vpack.c.bf16 %v90_v22, %v89_v19  ;;  %v2243_v28 = vpack.c.bf16 %v101_v25, %v100_v24  ;;  %v92_v29 = vld [vmem:[#allocation8 + $0x68] sm:$0xff]  ;;  %v102_v30 = vld [vmem:[#allocation8 + $0xb0] sm:$0xff]  ;;  %v103_v31 = vld [vmem:[#allocation8 + $0xb8] sm:$0xff]  ;;  %p2485_p7 = por %p2484_p6, %p2483_p5 }
  0x51   :  { %2210 = vmatpush3.bf16.msra.mxu0 %v2207_v5  ;;  %2238 = vmatpush3.bf16.msra.mxu1 %v2235_v20  ;;  %v2227_v32 = vpack.c.bf16 %v92_v29, %v91_v27  ;;  %v93_v33 = vld [vmem:[#allocation8 + $0x70] sm:$0xff]  ;;  %v2247_v34 = vpack.c.bf16 %v103_v31, %v102_v30  ;;  %v94_v35 = vld [vmem:[#allocation8 + $0x78] sm:$0xff]  ;;  %v104_v36 = vld [vmem:[#allocation8 + $0xc0] sm:$0xff] }
  0x52   :  { %2212 = vmatprep.subr.bf16.mxu0 %v2211_v8  ;;  %2240 = vmatprep.subr.bf16.mxu1 %v2239_v23  ;;  %v105_v37 = vld [vmem:[#allocation8 + $0xc8] sm:$0xff]  ;;  %v2231_v38 = vpack.c.bf16 %v94_v35, %v93_v33  ;;  %v113_v39 = vld [vmem:[#allocation8 + $0x100] sm:$0xff]  ;;  %v106_v42 = vld [vmem:[#allocation8 + $0xd0] sm:$0xff]  ;;  %p2486_p8 = pnand %p2485_p7, %p2479_p4 }
  0x53   :  { %v2251_v40 = vpack.c.bf16 %v105_v37, %v104_v36  ;;  %v114_v41 = vld [vmem:[#allocation8 + $0x108] sm:$0xff]  ;;  %v107_v43 = vld [vmem:[#allocation8 + $0xd8] sm:$0xff]  ;;  %v115_v46 = vld [vmem:[#allocation8 + $0x110] sm:$0xff] }
  0x54   :  { %v2267_v44 = vpack.c.bf16 %v114_v41, %v113_v39  ;;  %v2255_v45 = vpack.c.bf16 %v107_v43, %v106_v42  ;;  %v116_v47 = vld [vmem:[#allocation8 + $0x118] sm:$0xff]  ;;  %v108_v48 = vld [vmem:[#allocation8 + $0xe0] sm:$0xff]  ;;  %v109_v49 = vld [vmem:[#allocation8 + $0xe8] sm:$0xff] }
  0x55   :  { %2214 = vmatpush3.bf16.msra.mxu0 %v2211_v8  ;;  %2242 = vmatpush3.bf16.msra.mxu1 %v2239_v23  ;;  %v151_v50 = vld [vmem:[#allocation2 + $0x8] sm:$0xff]  ;;  %v2271_v51 = vpack.c.bf16 %v116_v47, %v115_v46  ;;  %v312_v52 = vld [vmem:[#allocation7] sm:$0xff]  ;;  %v117_v53 = vld [vmem:[#allocation8 + $0x120] sm:$0xff]  ;;  %v2259_v55 = vpack.c.bf16 %v109_v49, %v108_v48 }
  0x56   :  { %2216 = vmatprep.subr.bf16.mxu0 %v2215_v12  ;;  %2244 = vmatprep.subr.bf16.mxu1 %v2243_v28  ;;  %v118_v54 = vld [vmem:[#allocation8 + $0x128] sm:$0xff]  ;;  %v110_v56 = vld [vmem:[#allocation8 + $0xf0] sm:$0xff]  ;;  %v111_v57 = vld [vmem:[#allocation8 + $0xf8] sm:$0xff] }
  0x57   :  { %v2275_v58 = vpack.c.bf16 %v118_v54, %v117_v53  ;;  %v119_v59 = vld [vmem:[#allocation8 + $0x130] sm:$0xff]  ;;  %v120_v60 = vld [vmem:[#allocation8 + $0x138] sm:$0xff]  ;;  %v2263_v61 = vpack.c.bf16 %v111_v57, %v110_v56  ;;  %v121_v63 = vld [vmem:[#allocation8 + $0x140] sm:$0xff] }
  0x58   :  { %v2279_v62 = vpack.c.bf16 %v120_v60, %v119_v59  ;;  %v122_v0 = vld [vmem:[#allocation8 + $0x148] sm:$0xff]  ;;  %v123_v2 = vld [vmem:[#allocation8 + $0x150] sm:$0xff]  ;;  %v124_v3 = vld [vmem:[#allocation8 + $0x158] sm:$0xff] }
  0x59   :  { %2218 = vmatpush3.bf16.msra.mxu0 %v2215_v12  ;;  %2246 = vmatpush3.bf16.msra.mxu1 %v2243_v28  ;;  %v2283_v1 = vpack.c.bf16 %v122_v0, %v121_v63  ;;  %v2287_v4 = vpack.c.bf16 %v124_v3, %v123_v2  ;;  %v125_v5 = vld [vmem:[#allocation8 + $0x160] sm:$0xff]  ;;  %v126_v6 = vld [vmem:[#allocation8 + $0x168] sm:$0xff]  ;;  %v127_v8 = vld [vmem:[#allocation8 + $0x170] sm:$0xff] }
  0x5a   :  { %2220 = vmatprep.subr.bf16.mxu0 %v2219_v18  ;;  %2248 = vmatprep.subr.bf16.mxu1 %v2247_v34  ;;  %v2291_v7 = vpack.c.bf16 %v126_v6, %v125_v5  ;;  %v128_v9 = vld [vmem:[#allocation8 + $0x178] sm:$0xff]  ;;  %v231_v12 = vld [vmem:[#allocation5] sm:$0xff]  ;;  %v232_v13 = vld [vmem:[#allocation5 + $0x8] sm:$0xff] }
  0x5b   :  { %v2295_v10 = vpack.c.bf16 %v128_v9, %v127_v8  ;;  %v313_v11 = vld [vmem:[#allocation7 + $0x8] sm:$0xff]  ;;  %2050 = vmatprep.mubr.f32.mxu1 %v231_v12  ;;  %v1851_v15 = vld [vmem:[%s2846_s5] ss:$0 sm:$0xff]  ;;  %v1853_v20 = vld [vmem:[%s2846_s5 + $0x2] ss:$0 sm:$0xff] }
  0x5c   :  { %v1852_v25 = vld [vmem:[%s2846_s5 + $0x1] ss:$0 sm:$0xff] }
  0x5d   :  { %2222 = vmatpush3.bf16.msra.mxu0 %v2219_v18  ;;  %2250 = vmatpush3.bf16.msra.mxu1 %v2247_v34  ;;  %v393_v30 = vld [vmem:[%s2844_s3] sm:$0x3]  ;;  %s2517_s3 = smov 64  }
  0x5e   :  { %2224 = vmatprep.subr.bf16.mxu0 %v2223_v26  ;;  %2252 = vmatprep.subr.bf16.mxu1 %v2251_v40  ;;  %v394_v31 = vcvt.s32.f32 %v393_v30 }
  0x60   :  { %v395_v33 = vsub.f32 1.0, %v394_v31 }
  0x61   :  { %2226 = vmatpush3.bf16.msra.mxu0 %v2223_v26  ;;  %2254 = vmatpush3.bf16.msra.mxu1 %v2251_v40 }
  0x62   :  { %2228 = vmatprep.subr.bf16.mxu0 %v2227_v32  ;;  %2256 = vmatprep.subr.bf16.mxu1 %v2255_v45  ;;  %v2671_v35 = vmul.f32 -1e+30, %v395_v33 }
  0x65   :  { %2230 = vmatpush3.bf16.msra.mxu0 %v2227_v32  ;;  %2258 = vmatpush3.bf16.msra.mxu1 %v2255_v45  ;;  %v397_v32 = vlaneseq }
  0x66   :  { %2232 = vmatprep.subr.bf16.mxu0 %v2231_v38  ;;  %2260 = vmatprep.subr.bf16.mxu1 %v2259_v55 }
  0x67   :  { %v2669_v34 = vshrl.u32 %v397_v32, 7 }
  0x69   :  { %2234 = vmatpush3.bf16.msra.mxu0 %v2231_v38  ;;  %2262 = vmatpush3.bf16.msra.mxu1 %v2259_v55  ;;  %v399_v36 = vsub.s32 0, %v2669_v34 }
  0x6a   :  { %2268 = vmatprep.subr.bf16.mxu0 %v2267_v44  ;;  %2264 = vmatprep.subr.bf16.mxu1 %v2263_v61 }
  0x6b   :  { %v2675_v37 = vrot.slane %v2671_v35, %v399_v36 }
  0x6c   :  { %2016 = vmatmul.mubr.f32.vlgmr.msra.gmra.mrb[0].mxu0 %v151_v50 }
  0x6d   :  { %2270 = vmatpush3.bf16.msra.mxu0 %v2267_v44  ;;  %2085 = vmatprep.mubr.f32.mxu0 %v312_v52 }
  0x6e   :  { %2272 = vmatprep.subr.bf16.mxu0 %v2271_v51  ;;  %2266 = vmatpush3.bf16.msra.mxu1 %v2263_v61 }
  0x6f   :  { %2088 = vmatprep.subr.mxu1 %v2514_v14 }
  0x71   :  { %2274 = vmatpush3.bf16.msra.mxu0 %v2271_v51  ;;  %2051 = vmatmul.mubr.f32.vlgmr.msra.gmra.mrb[0].mxu1 %v232_v13 }
  0x72   :  { %2276 = vmatprep.subr.bf16.mxu0 %v2275_v58  ;;  %2090 = vmatprep.mubr.msk.f32.mxu1 %vm2515_vm0, %v2514_v14 }
  0x75   :  { %2278 = vmatpush3.bf16.msra.mxu0 %v2275_v58 }
  0x76   :  { %2280 = vmatprep.subr.bf16.mxu0 %v2279_v62 }
  0x79   :  { %2282 = vmatpush3.bf16.msra.mxu0 %v2279_v62 }
  0x7a   :  { %2284 = vmatprep.subr.bf16.mxu0 %v2283_v1 }
  0x7d   :  { %2286 = vmatpush3.bf16.msra.mxu0 %v2283_v1 }
  0x7e   :  { %2288 = vmatprep.subr.bf16.mxu0 %v2287_v4 }
  0x81   :  { %2290 = vmatpush3.bf16.msra.mxu0 %v2287_v4 }
  0x82   :  { %2292 = vmatprep.subr.bf16.mxu0 %v2291_v7 }
  0x85   :  { %2294 = vmatpush3.bf16.msra.mxu0 %v2291_v7 }
  0x86   :  { %2296 = vmatprep.subr.bf16.mxu0 %v2295_v10 }
  0x89   :  { %2298 = vmatpush3.bf16.msra.mxu0 %v2295_v10 }
  0x8c   :  { %2086 = vmatmul.mubr.f32.vlgmr.msra.gmra.mrb[2].mxu0 %v313_v11 }
 0x13f   :  { %v2017_v16 = vpop.f32.mrb[0].mxu0 }
 0x140   :  { %v2635_v17 = vadd.f32 %v2017_v16, %v1851_v15  ;;  %v222_v18 = vpop.f32.mrb[1].mxu0 }
 0x141   :  { %v2637_v19 = vadd.f32 %v1851_v15, %v222_v18 }
 0x143   :  { %565 = vrot.lane.b32.xlu1 %v2637_v19, %s2516_s22  ;;  %2089 = vmatpush3.xpose.msk.msra.mxu1 %vm401_vm1, %v2637_v19 }
 0x144   :  { %2093 = vmatprep.subr.mxu1 %v2514_v14  ;;  %v2052_v26 = vpop.f32.mrb[0].mxu1 }
 0x145   :  { %v2660_v27 = vadd.f32 %v2052_v26, %v1852_v25  ;;  %v303_v28 = vpop.f32.mrb[1].mxu1 }
 0x146   :  { %v2662_v29 = vadd.f32 %v1852_v25, %v303_v28 }
 0x15f   :  { %v2087_v21 = vpop.f32.mrb[2].mxu0 }
 0x160   :  { %v2647_v22 = vadd.f32 %v2087_v21, %v1853_v20  ;;  %v384_v23 = vpop.f32.mrb[3].mxu0 }
 0x161   :  { %v2649_v24 = vadd.f32 %v1853_v20, %v384_v23 }
 0x163   :  { %563 = vrot.lane.b32.xlu1 %v2649_v24, %s2516_s22  ;;  %2091 = vmatmul.mubr.msk.f32.vlgmr.msra.gmra.mrb[2].mxu1 %vm401_vm1, %v2649_v24 }
 0x164   :  { %2095 = vmatprep.mubr.msk.f32.mxu1 %vm2515_vm0, %v2514_v14  ;;  %2094 = vmatpush3.msra.mxu1 %v2662_v29 }
 0x165   :  { %2098 = vmatprep.subr.mxu1 %v2514_v14 }
 0x1b5   :  { %v566_v50 = vpop.permute.xlu1 %565 }
 0x1d5   :  { %v564_v51 = vpop.permute.xlu1 %563 }
 0x236   :  { %v474_v38 = vpop.f32.mrb[2].mxu1 }
 0x237   :  { %v475_v39 = vadd.f32 %v474_v38, %v2675_v37  ;;  %v2092_v40 = vpop.f32.mrb[3].mxu1 }
 0x239   :  { %v479_v41 = vsel %vm478_vm2, %v475_v39, -inf }
 0x23a   :  { %480 = vmax.xlane.f32.xlu0 %v479_v41 }
 0x2c7   :  { %v481_v42 = vpop.xlane.xlu0 %480 }
 0x2c8   :  { %v482_v43 = vsub.f32 %v475_v39, %v481_v42 }
 0x2ca   :  { %v483_v44 = vmul.f32 1.442695, %v482_v43 }
 0x2cc   :  { %2358 = vpow2.f32 %v483_v44 }
 0x2d6   :  { %v2359_v45 = vpop.eup %2358 }
 0x2d7   :  { %v485_v46 = vsel %vm478_vm2, %v2359_v45, 0.0 }
 0x2d8   :  { %486 = vadd.xlane.f32.xlu0 %v485_v46 }
 0x365   :  { %v487_v47 = vpop.xlane.xlu0 %486 }
 0x366   :  { %2360 = vrcp.f32 %v487_v47 }
 0x370   :  { %v2361_v48 = vpop.eup %2360 }
 0x371   :  { %v489_v49 = vmul.f32 %v2361_v48, %v2359_v45 }
 0x373   :  { %2096 = vmatmul.mubr.msk.f32.vlgmr.msra.gmra.mrb[4].mxu1 %vm478_vm2, %v489_v49 }
 0x374   :  { %2099 = vmatpush3.xpose.msk.msra.mxu1 %vm401_vm1, %v566_v50  ;;  %2100 = vmatprep.mubr.msk.f32.mxu1 %vm2515_vm0, %v2514_v14 }
 0x375   :  { %2103 = vmatprep.subr.mxu1 %v2514_v14 }
 0x377   :  { %2101 = vmatmul.mubr.msk.f32.vlgmr.msra.gmra.mrb[6].mxu1 %vm401_vm1, %v564_v51 }
 0x378   :  { %2105 = vmatprep.mubr.msk.f32.mxu1 %vm2515_vm0, %v2514_v14 }
 0x446   :  { %v2688_v52 = vpop.f32.mrb[4].mxu1 }
 0x447   :  { %v2097_v53 = vpop.f32.mrb[5].mxu1 }
 0x44a   :  { %v637_v54 = vpop.f32.mrb[6].mxu1 }
 0x44b   :  { %v638_v55 = vadd.f32 %v637_v54, %v2675_v37  ;;  %v2102_v56 = vpop.f32.mrb[7].mxu1 }
 0x44d   :  { %v641_v57 = vsel %vm478_vm2, %v638_v55, -inf }
 0x44e   :  { %642 = vmax.xlane.f32.xlu0 %v641_v57 }
 0x464   :  { %653 = vrot.lane.b32.xlu0 %v2662_v29, %s2516_s22 }
 0x468   :  { %731 = vrot.lane.b32.xlu0 %v2637_v19, %s2517_s3 }
 0x46c   :  { %729 = vrot.lane.b32.xlu0 %v2649_v24, %s2517_s3 }
 0x4db   :  { %v643_v58 = vpop.xlane.xlu0 %642 }
 0x4dc   :  { %v644_v59 = vsub.f32 %v638_v55, %v643_v58 }
 0x4de   :  { %v645_v60 = vmul.f32 1.442695, %v644_v59 }
 0x4df   :  { %v654_v61 = vpop.permute.xlu0 %653 }
 0x4e0   :  { %2362 = vpow2.f32 %v645_v60  ;;  %2104 = vmatpush3.msra.mxu1 %v654_v61 }
 0x4e1   :  { %2108 = vmatprep.subr.mxu1 %v2514_v14 }
 0x4e3   :  { %v732_v2 = vpop.permute.xlu0 %731 }
 0x4e7   :  { %v730_v4 = vpop.permute.xlu0 %729 }
 0x4ea   :  { %v2363_v62 = vpop.eup %2362 }
 0x4eb   :  { %v647_v63 = vsel %vm478_vm2, %v2363_v62, 0.0 }
 0x4ec   :  { %648 = vadd.xlane.f32.xlu1 %v647_v63 }
 0x4fd   :  { %818 = vrot.lane.b32.xlu1 %v2662_v29, %s2517_s3 }
 0x501   :  { %896 = vrot.lane.b32.xlu1 %v2637_v19, %s2518_s30 }
 0x579   :  { %v649_v0 = vpop.xlane.xlu1 %648 }
 0x57a   :  { %2364 = vrcp.f32 %v649_v0 }
 0x57d   :  { %v819_v5 = vpop.permute.xlu1 %818 }
 0x581   :  { %v897_v19 = vpop.permute.xlu1 %896 }
 0x584   :  { %v2365_v1 = vpop.eup %2364 }
 0x585   :  { %v651_v3 = vmul.f32 %v2365_v1, %v2363_v62 }
 0x587   :  { %2106 = vmatmul.mubr.msk.f32.vlgmr.msra.gmra.mrb[8].mxu1 %vm478_vm2, %v651_v3 }
 0x588   :  { %2109 = vmatpush3.xpose.msk.msra.mxu1 %vm401_vm1, %v732_v2  ;;  %2110 = vmatprep.mubr.msk.f32.mxu1 %vm2515_vm0, %v2514_v14 }
 0x589   :  { %2113 = vmatprep.subr.mxu1 %v2514_v14 }
 0x58b   :  { %2111 = vmatmul.mubr.msk.f32.vlgmr.msra.gmra.mrb[10].mxu1 %vm401_vm1, %v730_v4 }
 0x58c   :  { %2114 = vmatpush3.msra.mxu1 %v819_v5  ;;  %2115 = vmatprep.mubr.msk.f32.mxu1 %vm2515_vm0, %v2514_v14 }
 0x58d   :  { %2118 = vmatprep.subr.mxu1 %v2514_v14 }
 0x65a   :  { %v2713_v6 = vpop.f32.mrb[8].mxu1 }
 0x65b   :  { %v2107_v7 = vpop.f32.mrb[9].mxu1 }
 0x65e   :  { %v803_v8 = vpop.f32.mrb[10].mxu1 }
 0x65f   :  { %v804_v9 = vadd.f32 %v803_v8, %v2675_v37  ;;  %v2112_v10 = vpop.f32.mrb[11].mxu1 }
 0x661   :  { %v807_v11 = vsel %vm478_vm2, %v804_v9, -inf }
 0x662   :  { %808 = vmax.xlane.f32.xlu0 %v807_v11 }
 0x6ef   :  { %v809_v12 = vpop.xlane.xlu0 %808 }
 0x6f0   :  { %v810_v13 = vsub.f32 %v804_v9, %v809_v12 }
 0x6f2   :  { %v811_v15 = vmul.f32 1.442695, %v810_v13 }
 0x6f4   :  { %2366 = vpow2.f32 %v811_v15 }
 0x6fe   :  { %v2367_v16 = vpop.eup %2366 }
 0x6ff   :  { %v813_v18 = vsel %vm478_vm2, %v2367_v16, 0.0 }
 0x700   :  { %814 = vadd.xlane.f32.xlu1 %v813_v18 }
 0x711   :  { %894 = vrot.lane.b32.xlu1 %v2649_v24, %s2518_s30 }
 0x78d   :  { %v815_v20 = vpop.xlane.xlu1 %814 }
 0x78e   :  { %2368 = vrcp.f32 %v815_v20 }
 0x791   :  { %v895_v25 = vpop.permute.xlu1 %894 }
 0x798   :  { %v2369_v21 = vpop.eup %2368 }
 0x799   :  { %v817_v23 = vmul.f32 %v2369_v21, %v2367_v16 }
 0x79b   :  { %2116 = vmatmul.mubr.msk.f32.vlgmr.msra.gmra.mrb[12].mxu1 %vm478_vm2, %v817_v23 }
 0x79c   :  { %2119 = vmatpush3.xpose.msk.msra.mxu1 %vm401_vm1, %v897_v19  ;;  %2120 = vmatprep.mubr.msk.f32.mxu1 %vm2515_vm0, %v2514_v14 }
 0x79d   :  { %2123 = vmatprep.subr.mxu1 %v2514_v14 }
 0x79f   :  { %2121 = vmatmul.mubr.msk.f32.vlgmr.msra.gmra.mrb[14].mxu1 %vm401_vm1, %v895_v25 }
 0x7a0   :  { %2125 = vmatprep.mubr.msk.f32.mxu1 %vm2515_vm0, %v2514_v14 }
 0x86e   :  { %v2728_v24 = vpop.f32.mrb[12].mxu1 }
 0x86f   :  { %v2117_v26 = vpop.f32.mrb[13].mxu1 }
 0x872   :  { %v968_v28 = vpop.f32.mrb[14].mxu1 }
 0x873   :  { %v969_v30 = vadd.f32 %v968_v28, %v2675_v37  ;;  %v2122_v31 = vpop.f32.mrb[15].mxu1 }
 0x875   :  { %v972_v32 = vsel %vm478_vm2, %v969_v30, -inf }
 0x876   :  { %973 = vmax.xlane.f32.xlu0 %v972_v32 }
 0x88c   :  { %983 = vrot.lane.b32.xlu0 %v2662_v29, %s2518_s30  ;;  %v1078_v29 = vsub.s32 1, %v2669_v34 }
 0x88e   :  { %v2752_v46 = vrot.slane %v2671_v35, %v1078_v29 }
 0x903   :  { %v974_v33 = vpop.xlane.xlu0 %973 }
 0x904   :  { %v975_v36 = vsub.f32 %v969_v30, %v974_v33 }
 0x906   :  { %v976_v38 = vmul.f32 1.442695, %v975_v36 }
 0x907   :  { %v984_v39 = vpop.permute.xlu0 %983 }
 0x908   :  { %2370 = vpow2.f32 %v976_v38  ;;  %2124 = vmatpush3.msra.mxu1 %v984_v39 }
 0x909   :  { %2128 = vmatprep.subr.mxu1 %v2514_v14 }
 0x912   :  { %v2371_v40 = vpop.eup %2370 }
 0x913   :  { %v978_v41 = vsel %vm478_vm2, %v2371_v40, 0.0 }
 0x914   :  { %979 = vadd.xlane.f32.xlu1 %v978_v41 }
 0x9a1   :  { %v980_v37 = vpop.xlane.xlu1 %979 }
 0x9a2   :  { %2372 = vrcp.f32 %v980_v37 }
 0x9ac   :  { %v2373_v42 = vpop.eup %2372 }
 0x9ad   :  { %v982_v43 = vmul.f32 %v2373_v42, %v2371_v40 }
 0x9af   :  { %2126 = vmatmul.mubr.msk.f32.vlgmr.msra.gmra.mrb[16].mxu1 %vm478_vm2, %v982_v43 }
 0x9b0   :  { %2129 = vmatpush3.xpose.msk.msra.mxu1 %vm401_vm1, %v2635_v17  ;;  %2130 = vmatprep.mubr.msk.f32.mxu1 %vm2515_vm0, %v2514_v14 }
 0x9b1   :  { %2133 = vmatprep.subr.mxu1 %v2514_v14 }
 0x9b3   :  { %2131 = vmatmul.mubr.msk.f32.vlgmr.msra.gmra.mrb[18].mxu1 %vm401_vm1, %v2647_v22 }
 0x9b4   :  { %2134 = vmatpush3.msra.mxu1 %v2660_v27  ;;  %2135 = vmatprep.mubr.msk.f32.mxu1 %vm2515_vm0, %v2514_v14 }
 0x9b5   :  { %2138 = vmatprep.subr.mxu1 %v2514_v14 }
 0xa82   :  { %v2749_v44 = vpop.f32.mrb[16].mxu1 }
 0xa83   :  { %v2127_v45 = vpop.f32.mrb[17].mxu1 }
 0xa86   :  { %v1152_v47 = vpop.f32.mrb[18].mxu1 }
 0xa87   :  { %v1153_v48 = vadd.f32 %v1152_v47, %v2752_v46  ;;  %v2132_v49 = vpop.f32.mrb[19].mxu1 }
 0xa89   :  { %v1156_v50 = vsel %vm478_vm2, %v1153_v48, -inf }
 0xa8a   :  { %1157 = vmax.xlane.f32.xlu0 %v1156_v50 }
 0xaa0   :  { %1240 = vrot.lane.b32.xlu0 %v2647_v22, %s2516_s22 }
 0xb17   :  { %v1158_v51 = vpop.xlane.xlu0 %1157 }
 0xb18   :  { %v1159_v53 = vsub.f32 %v1153_v48, %v1158_v51  ;;  %v131_v51 = vld [vmem:[#allocation8 + $0x188] sm:$0xff] }
 0xb1a   :  { %v1160_v54 = vmul.f32 1.442695, %v1159_v53  ;;  %v132_v53 = vld [vmem:[#allocation8 + $0x190] sm:$0xff] }
 0xb1b   :  { %v1241_v59 = vpop.permute.xlu0 %1240 }
 0xb1c   :  { %2374 = vpow2.f32 %v1160_v54 }
 0xb26   :  { %v2375_v34 = vpop.eup %2374 }
 0xb27   :  { %v1162_v55 = vsel %vm478_vm2, %v2375_v34, 0.0 }
 0xb28   :  { %1163 = vadd.xlane.f32.xlu1 %v1162_v55 }
 0xb39   :  { %1242 = vrot.lane.b32.xlu1 %v2635_v17, %s2516_s22 }
 0xbb5   :  { %v1164_v35 = vpop.xlane.xlu1 %1163 }
 0xbb6   :  { %2376 = vrcp.f32 %v1164_v35  ;;  %v134_v35 = vld [vmem:[#allocation8 + $0x1a0] sm:$0xff] }
 0xbb9   :  { %v1243_v58 = vpop.permute.xlu1 %1242 }
 0xbc0   :  { %v2377_v56 = vpop.eup %2376 }
 0xbc1   :  { %v1166_v57 = vmul.f32 %v2377_v56, %v2375_v34  ;;  %v133_v34 = vld [vmem:[#allocation8 + $0x198] sm:$0xff]  ;;  %v135_v56 = vld [vmem:[#allocation8 + $0x1a8] sm:$0xff] }
 0xbc2   :  { %v2303_v55 = vpack.c.bf16 %v133_v34, %v132_v53 }
 0xbc3   :  { %2136 = vmatmul.mubr.msk.f32.vlgmr.msra.gmra.mrb[20].mxu1 %vm478_vm2, %v1166_v57  ;;  %v2307_v57 = vpack.c.bf16 %v135_v56, %v134_v35 }
 0xbc4   :  { %2139 = vmatpush3.xpose.msk.msra.mxu1 %vm401_vm1, %v1243_v58  ;;  %2140 = vmatprep.mubr.msk.f32.mxu1 %vm2515_vm0, %v2514_v14  ;;  %v136_v58 = vld [vmem:[#allocation8 + $0x1b0] sm:$0xff] }
 0xbc5   :  { %2143 = vmatprep.subr.mxu1 %v2514_v14 }
 0xbc7   :  { %2141 = vmatmul.mubr.msk.f32.vlgmr.msra.gmra.mrb[22].mxu1 %vm401_vm1, %v1241_v59  ;;  %v137_v59 = vld [vmem:[#allocation8 + $0x1b8] sm:$0xff] }
 0xbc8   :  { %2145 = vmatprep.mubr.msk.f32.mxu1 %vm2515_vm0, %v2514_v14 }
 0xc96   :  { %v2769_v60 = vpop.f32.mrb[20].mxu1 }
 0xc97   :  { %v2137_v61 = vpop.f32.mrb[21].mxu1 }
 0xc98   :  { %v2311_v61 = vpack.c.bf16 %v137_v59, %v136_v58 }
 0xc9a   :  { %v1314_v62 = vpop.f32.mrb[22].mxu1 }
 0xc9b   :  { %v1315_v63 = vadd.f32 %v1314_v62, %v2752_v46  ;;  %v2142_v0 = vpop.f32.mrb[23].mxu1  ;;  %v138_v62 = vld [vmem:[#allocation8 + $0x1c0] sm:$0xff] }
 0xc9d   :  { %v1318_v1 = vsel %vm478_vm2, %v1315_v63, -inf }
 0xc9e   :  { %1319 = vmax.xlane.f32.xlu1 %v1318_v1  ;;  %v140_v1 = vld [vmem:[#allocation8 + $0x1d0] sm:$0xff] }
 0xcaf   :  { %1330 = vrot.lane.b32.xlu1 %v2660_v27, %s2516_s22 }
 0xcb3   :  { %1406 = vrot.lane.b32.xlu1 %v2647_v22, %s2517_s3 }
 0xd2b   :  { %v1320_v2 = vpop.xlane.xlu1 %1319 }
 0xd2c   :  { %v1321_v3 = vsub.f32 %v1315_v63, %v1320_v2  ;;  %v139_v63 = vld [vmem:[#allocation8 + $0x1c8] sm:$0xff]  ;;  %v141_v2 = vld [vmem:[#allocation8 + $0x1d8] sm:$0xff] }
 0xd2d   :  { %v2315_v0 = vpack.c.bf16 %v139_v63, %v138_v62 }
 0xd2e   :  { %v1322_v4 = vmul.f32 1.442695, %v1321_v3  ;;  %v2319_v3 = vpack.c.bf16 %v141_v2, %v140_v1 }
 0xd2f   :  { %v1331_v5 = vpop.permute.xlu1 %1330 }
 0xd30   :  { %2378 = vpow2.f32 %v1322_v4  ;;  %2144 = vmatpush3.msra.mxu1 %v1331_v5  ;;  %v142_v4 = vld [vmem:[#allocation8 + $0x1e0] sm:$0xff]  ;;  %v143_v5 = vld [vmem:[#allocation8 + $0x1e8] sm:$0xff] }
 0xd31   :  { %2148 = vmatprep.subr.mxu1 %v2514_v14 }
 0xd33   :  { %v1407_v13 = vpop.permute.xlu1 %1406 }
 0xd3a   :  { %v2379_v7 = vpop.eup %2378 }
 0xd3b   :  { %v1324_v8 = vsel %vm478_vm2, %v2379_v7, 0.0 }
 0xd3c   :  { %1325 = vadd.xlane.f32.xlu0 %v1324_v8  ;;  %v144_v8 = vld [vmem:[#allocation8 + $0x1f0] sm:$0xff] }
 0xd52   :  { %1408 = vrot.lane.b32.xlu0 %v2635_v17, %s2517_s3 }
 0xdc9   :  { %v1326_v9 = vpop.xlane.xlu0 %1325 }
 0xdca   :  { %2380 = vrcp.f32 %v1326_v9  ;;  %v145_v9 = vld [vmem:[#allocation8 + $0x1f8] sm:$0xff] }
 0xdcd   :  { %v1409_v12 = vpop.permute.xlu0 %1408 }
 0xdd4   :  { %v2381_v10 = vpop.eup %2380 }
 0xdd5   :  { %v1328_v11 = vmul.f32 %v2381_v10, %v2379_v7  ;;  %v2323_v7 = vpack.c.bf16 %v143_v5, %v142_v4  ;;  %v2327_v10 = vpack.c.bf16 %v145_v9, %v144_v8 }
 0xdd7   :  { %2146 = vmatmul.mubr.msk.f32.vlgmr.msra.gmra.mrb[24].mxu1 %vm478_vm2, %v1328_v11 }
 0xdd8   :  { %2149 = vmatpush3.xpose.msk.msra.mxu1 %vm401_vm1, %v1409_v12  ;;  %2150 = vmatprep.mubr.msk.f32.mxu1 %vm2515_vm0, %v2514_v14 }
 0xdd9   :  { %2153 = vmatprep.subr.mxu1 %v2514_v14 }
 0xddb   :  { %2151 = vmatmul.mubr.msk.f32.vlgmr.msra.gmra.mrb[26].mxu1 %vm401_vm1, %v1407_v13 }
 0xddc   :  { %2155 = vmatprep.mubr.msk.f32.mxu1 %vm2515_vm0, %v2514_v14 }
 0xeaa   :  { %v1402_v15 = vpop.f32.mrb[24].mxu1 }
 0xeab   :  { %v2343_v16 = vpack.i.bf16 %v1402_v15, %v2713_v6  ;;  %v2147_v18 = vpop.f32.mrb[25].mxu1 }
 0xeae   :  { %v1480_v19 = vpop.f32.mrb[26].mxu1 }
 0xeaf   :  { %v1481_v20 = vadd.f32 %v1480_v19, %v2752_v46  ;;  %v2152_v21 = vpop.f32.mrb[27].mxu1 }
 0xeb1   :  { %v1484_v23 = vsel %vm478_vm2, %v1481_v20, -inf }
 0xeb2   :  { %1485 = vmax.xlane.f32.xlu1 %v1484_v23 }
 0xec3   :  { %1495 = vrot.lane.b32.xlu1 %v2660_v27, %s2517_s3 }
 0xec7   :  { %1571 = vrot.lane.b32.xlu1 %v2647_v22, %s2518_s30 }
 0xf3f   :  { %v1486_v25 = vpop.xlane.xlu1 %1485 }
 0xf40   :  { %v1487_v26 = vsub.f32 %v1481_v20, %v1486_v25 }
 0xf42   :  { %v1488_v28 = vmul.f32 1.442695, %v1487_v26 }
 0xf43   :  { %v1496_v30 = vpop.permute.xlu1 %1495 }
 0xf44   :  { %2382 = vpow2.f32 %v1488_v28  ;;  %2154 = vmatpush3.msra.mxu1 %v1496_v30 }
 0xf45   :  { %2158 = vmatprep.subr.mxu1 %v2514_v14 }
 0xf47   :  { %v1572_v38 = vpop.permute.xlu1 %1571 }
 0xf4e   :  { %v2383_v6 = vpop.eup %2382 }
 0xf4f   :  { %v1490_v31 = vsel %vm478_vm2, %v2383_v6, 0.0 }
 0xf50   :  { %1491 = vadd.xlane.f32.xlu0 %v1490_v31 }
 0xf66   :  { %1573 = vrot.lane.b32.xlu0 %v2635_v17, %s2518_s30 }
 0xfdd   :  { %v1492_v32 = vpop.xlane.xlu0 %1491 }
 0xfde   :  { %2384 = vrcp.f32 %v1492_v32 }
 0xfe1   :  { %v1574_v22 = vpop.permute.xlu0 %1573 }
 0xfe8   :  { %v2385_v33 = vpop.eup %2384 }
 0xfe9   :  { %v1494_v36 = vmul.f32 %v2385_v33, %v2383_v6 }
 0xfeb   :  { %2156 = vmatmul.mubr.msk.f32.vlgmr.msra.gmra.mrb[28].mxu1 %vm478_vm2, %v1494_v36 }
 0xfec   :  { %2159 = vmatpush3.xpose.msk.msra.mxu1 %vm401_vm1, %v1574_v22  ;;  %2160 = vmatprep.mubr.msk.f32.mxu1 %vm2515_vm0, %v2514_v14 }
 0xfed   :  { %2163 = vmatprep.subr.mxu1 %v2514_v14 }
 0xfef   :  { %2161 = vmatmul.mubr.msk.f32.vlgmr.msra.gmra.mrb[30].mxu1 %vm401_vm1, %v1572_v38 }
 0xff0   :  { %2165 = vmatprep.mubr.msk.f32.mxu1 %vm2515_vm0, %v2514_v14 }
0x10be   :  { %v1567_v17 = vpop.f32.mrb[28].mxu1 }
0x10bf   :  { %v2348_v39 = vpack.i.bf16 %v1567_v17, %v2728_v24  ;;  %v2157_v40 = vpop.f32.mrb[29].mxu1 }
0x10c2   :  { %v1645_v41 = vpop.f32.mrb[30].mxu1 }
0x10c3   :  { %v1646_v37 = vadd.f32 %v1645_v41, %v2752_v46  ;;  %v2162_v42 = vpop.f32.mrb[31].mxu1 }
0x10c5   :  { %v1649_v43 = vsel %vm478_vm2, %v1646_v37, -inf }
0x10c6   :  { %1650 = vmax.xlane.f32.xlu1 %v1649_v43 }
0x10d7   :  { %1660 = vrot.lane.b32.xlu1 %v2660_v27, %s2518_s30  ;;  %v130_v27 = vld [vmem:[#allocation8 + $0x180] sm:$0xff] }
0x10d8   :  { %v2299_v54 = vpack.c.bf16 %v131_v51, %v130_v27 }
0x10da   :  { %2300 = vmatprep.subr.bf16.mxu0 %v2299_v54 }
0x10db   :  { %2349 = vrot.lane.b32.xlu1 %v2348_v39, %s2517_s3  ;;  %2302 = vmatpush3.bf16.msra.mxu0 %v2299_v54 }
0x10dc   :  { %2304 = vmatprep.subr.bf16.mxu0 %v2303_v55 }
0x10df   :  { %2306 = vmatpush3.bf16.msra.mxu0 %v2303_v55 }
0x10e0   :  { %2308 = vmatprep.subr.bf16.mxu0 %v2307_v57 }
0x10e3   :  { %2310 = vmatpush3.bf16.msra.mxu0 %v2307_v57 }
0x10e4   :  { %2312 = vmatprep.subr.bf16.mxu0 %v2311_v61 }
0x10e7   :  { %2314 = vmatpush3.bf16.msra.mxu0 %v2311_v61 }
0x10e8   :  { %2316 = vmatprep.subr.bf16.mxu0 %v2315_v0 }
0x10eb   :  { %2318 = vmatpush3.bf16.msra.mxu0 %v2315_v0 }
0x10ec   :  { %2320 = vmatprep.subr.bf16.mxu0 %v2319_v3 }
0x10ef   :  { %2322 = vmatpush3.bf16.msra.mxu0 %v2319_v3 }
0x10f0   :  { %2324 = vmatprep.subr.bf16.mxu0 %v2323_v7 }
0x10f3   :  { %2326 = vmatpush3.bf16.msra.mxu0 %v2323_v7 }
0x10f4   :  { %2328 = vmatprep.subr.bf16.mxu0 %v2327_v10 }
0x10f7   :  { %2330 = vmatpush3.bf16.msra.mxu0 %v2327_v10 }
0x1153   :  { %v1651_v29 = vpop.xlane.xlu1 %1650 }
0x1154   :  { %v1652_v45 = vsub.f32 %v1646_v37, %v1651_v29 }
0x1156   :  { %v1653_v47 = vmul.f32 1.442695, %v1652_v45 }
0x1157   :  { %v1661_v14 = vpop.permute.xlu1 %1660 }
0x1158   :  { %2386 = vpow2.f32 %v1653_v47  ;;  %2164 = vmatpush3.msra.mxu1 %v1661_v14 }
0x115b   :  { %v2350_v19 = vpop.permute.xlu1 %2349 }
0x115c   :  { %v2352_v23 = vunpack.i.h.bf16 %v2350_v19  ;;  %v2351_v25 = vunpack.i.l.bf16 %v2350_v19 }
0x1162   :  { %v2387_v24 = vpop.eup %2386 }
0x1163   :  { %v1655_v48 = vsel %vm478_vm2, %v2387_v24, 0.0 }
0x1164   :  { %1656 = vadd.xlane.f32.xlu0 %v1655_v48 }
0x117a   :  { %2344 = vrot.lane.b32.xlu0 %v2343_v16, %s2518_s30 }
0x11f1   :  { %v1657_v46 = vpop.xlane.xlu0 %1656 }
0x11f2   :  { %2388 = vrcp.f32 %v1657_v46 }
0x11f5   :  { %v2345_v15 = vpop.permute.xlu0 %2344 }
0x11f6   :  { %v2347_v16 = vunpack.i.h.bf16 %v2345_v15  ;;  %v2346_v18 = vunpack.i.l.bf16 %v2345_v15 }
0x11f8   :  { %v1748_v20 = vsel %vm401_vm1, %v2769_v60, %v2347_v16  ;;  %v1071_v21 = vsel %vm401_vm1, %v2688_v52, %v2346_v18  ;;  %v1878_v60 = vld [vmem:[%s2846_s5 + $0x3] ss:$0 sm:$0xff] }
0x11f9   :  { %v1073_v30 = vsel %vm1072_vm3, %v1071_v21, %v2351_v25  ;;  %v1749_v6 = vsel %vm1072_vm3, %v1748_v20, %v2352_v23 }
0x11fc   :  { %v2389_v49 = vpop.eup %2388 }
0x11fd   :  { %v1659_v50 = vmul.f32 %v2389_v49, %v2387_v24 }
0x11ff   :  { %2166 = vmatmul.mubr.msk.f32.vlgmr.msra.gmra.mrb[32].mxu1 %vm478_vm2, %v1659_v50 }
0x12d2   :  { %v1732_v11 = vpop.f32.mrb[32].mxu1 }
0x12d3   :  { %v2353_v12 = vpack.i.bf16 %v1732_v11, %v2749_v44  ;;  %v2167_v13 = vpop.f32.mrb[33].mxu1 }
0x12d5   :  { %2354 = vrot.lane.b32.xlu1 %v2353_v12, %s2516_s22 }
0x1347   :  { %v2355_v26 = vpop.permute.xlu1 %2354 }
0x1348   :  { %v2357_v28 = vunpack.i.h.bf16 %v2355_v26  ;;  %v2356_v44 = vunpack.i.l.bf16 %v2355_v26 }
0x134a   :  { %v1075_v31 = vsel %vm1074_vm4, %v1073_v30, %v2356_v44  ;;  %v1750_v32 = vsel %vm1074_vm4, %v1749_v6, %v2357_v28 }
0x134b   :  { %2200 = vmatprep.mubr.f32.mxu0 %v1075_v31 }
0x134c   :  { %2201 = vmatmul.mubr.f32.vlgmr.msra.gmra.mrb[4].mxu0 %v1750_v32 }
0x141f   :  { %v2202_v52 = vpop.f32.mrb[4].mxu0 }
0x1420   :  { %v1827_v33 = vadd.f32 %v2202_v52, %v1878_v60  ;;  %v1821_v36 = vpop.f32.mrb[5].mxu0 }
0x1421   :  { %v1822_v22 = vadd.f32 %v1878_v60, %v1821_v36 }
0x1422   :  { %1831 = vst [vmem:[#allocation10 + $0x8] sm:$0xff] %v1827_v33 }
0x1423   :  { %1830 = vst [vmem:[#allocation10] sm:$0xff] %v1822_v22 }
0x1424   :  { %2489 = shalt.err (!%p2486_p8)
}
0x1425   :  { %s2490_s5 = scalar_lea.hbm %s2847_s6, 256 }
0x1426   :  { %p2491_p9 = scmp.ne.s32.totalorder %s2847_s6, %s2490_s5  ;;  %p2494_p10 = scmp.lt.u32.totalorder %s2490_s5, %s2847_s6 }
0x1428   :  { %p2496_p11 = pnand %p2494_p10, %p2491_p9 }
0x142a   :  { %2499 = shalt.err (!%p2496_p11)
}
0x142b   :  { %1843 = dma.vmem_to_hbm [thread:$0]  %s1838_s0, 256, %s2847_s6, [#allocation4], %s2510_s9, %s2510_s9, %s2511_s10  }
0x142c   :  { %2506 = dma.done.wait [#allocation4], 256  }
0x142d   :  { %2507 = vsyncadd [#allocation4], 4294967040 }
0x142e   :  { %1847 = vsyncpa [#allocation3], 1 }
0x142f   :  { %1848 = vsyncpa [#allocation6], 1 }
0x1430   :  { %1849 = vsyncpa [#allocation9], 1 }
0x1431   :  { %1850 = vsyncpa [#allocation4], 1 }

</bundles_post_ra>
